<compile_context>
chip_gen: v7x
topology: tpu7x:2x2x1
jax: 0.10.0
libtpu: 0.0.40
codegen_flags: <defaults>
</compile_context>

<pallas_src>
import functools

import jax
import jax.numpy as jnp
import numpy as np
from jax.experimental import pallas as pl
from jax.experimental.pallas import tpu as pltpu


# ---------------------------------------------------------------------------
# Fused kernel: conv(all windows) + bias + tanh + max + Linear + LogSoftmax
# for one batch tile.
# ---------------------------------------------------------------------------
def _textcnn_fused_kernel(x_ref, w_ref, cb_ref, fcw_ref, fcb_ref, o_ref, *,
                          window_sizes):
    # x_ref:   (TB, L, 2E)  VMEM (f32 or bf16)
    # w_ref:   (2E, n_cols) VMEM packed conv filters (same dtype as x)
    # cb_ref:  (n_windows,) SMEM f32 conv biases (scalar path)
    # fcw_ref: (n_windows, num_classes) VMEM f32
    # fcb_ref: (1, num_classes)         VMEM f32
    # o_ref:   (TB, num_classes)        VMEM f32 log-probs
    tb, L, two_e = x_ref.shape
    n_cols = w_ref.shape[1]
    nc = fcb_ref.shape[-1]

    # One MXU matmul gives, for every position t and every (window, offset)
    # pair, the partial dot product <x[b, t, :], w_window[offset, :]>.
    x = x_ref[...]
    s = jnp.dot(x.reshape(tb * L, two_e), w_ref[...],
                preferred_element_type=jnp.float32)
    s = s.reshape(tb, L, n_cols)

    fcw = fcw_ref[...]                                     # (nw, nc) f32
    logits = jnp.broadcast_to(fcb_ref[...], (tb, nc))      # hoisted broadcast

    # Per-window: diagonal combine + bias + tanh + max, then a rank-1 FC update
    # (fused Linear; features tensor never round-trips through HBM).
    c0 = 0
    for j, wsz in enumerate(window_sizes):
        lout = L - wsz + 1
        acc = s[:, 0:lout, c0]
        for i in range(1, wsz):
            acc = acc + s[:, i:i + lout, c0 + i]
        acc = acc + cb_ref[j]                              # scalar bias from SMEM
        feat = jnp.max(jnp.tanh(acc), axis=-1, keepdims=True)   # (TB, 1)
        logits = logits + feat * fcw[j:j + 1, :]           # (TB,1)*(1,nc)
        c0 += wsz

    # LogSoftmax epilogue (f32).
    z = logits - jnp.max(logits, axis=-1, keepdims=True)
    lse = jnp.log(jnp.sum(jnp.exp(z), axis=-1, keepdims=True))
    o_ref[...] = (z - lse).astype(o_ref.dtype)


# ---------------------------------------------------------------------------
# Wrapper: layout prep + single pallas_call.
# ---------------------------------------------------------------------------
def text_cnn_forward(sentences, fixed_emb, train_emb, conv_ws, conv_bs, fc_w,
                     fc_b, *, block_b=128, compute_dtype=jnp.float32,
                     vmem_limit_bytes=48 * 1024 * 1024):
    """sentences: (B, L) int32; fixed_emb/train_emb: (V, E) f32;
    conv_ws[j]: (2, wsz_j, E); conv_bs[j]: (1,);
    fc_w: (n_windows, num_classes) (PyTorch Linear weight transposed); fc_b: (C,)."""
    B, L = sentences.shape
    E = fixed_emb.shape[1]
    window_sizes = tuple(int(w.shape[1]) for w in conv_ws)
    n_cols = sum(window_sizes)
    nw = len(window_sizes)
    nc = fc_w.shape[1]

    # Channel-concat layout: one (V, 2E) table -> one gather -> x (B, L, 2E).
    table = jnp.concatenate([fixed_emb, train_emb], axis=-1).astype(compute_dtype)
    x = jnp.take(table, sentences, axis=0)

    # Pack all conv filters: column (window j, offset i) = [w_j[0,i,:] ; w_j[1,i,:]].
    cols = []
    for w in conv_ws:
        for i in range(w.shape[1]):
            cols.append(jnp.concatenate([w[0, i], w[1, i]], axis=0))     # (2E,)
    w_pack = jnp.stack(cols, axis=-1).astype(compute_dtype)              # (2E, n_cols)
    conv_b = jnp.concatenate(
        [jnp.reshape(b, (-1,)) for b in conv_bs]).astype(jnp.float32)    # (nw,)

    # Batch tiling: double-buffered pipeline over B.
    tb = int(min(block_b, B))
    num_tiles = pl.cdiv(B, tb)
    Bp = num_tiles * tb
    if Bp != B:
        x = jnp.pad(x, ((0, Bp - B), (0, 0), (0, 0)))

    kernel = functools.partial(_textcnn_fused_kernel, window_sizes=window_sizes)
    out = pl.pallas_call(
        kernel,
        grid=(num_tiles,),
        in_specs=[
            pl.BlockSpec((tb, L, 2 * E), lambda i: (i, 0, 0)),       # x tile
            pl.BlockSpec((2 * E, n_cols), lambda i: (0, 0)),         # packed conv W
            pl.BlockSpec(memory_space=pltpu.MemorySpace.SMEM),       # conv biases
            pl.BlockSpec((nw, nc), lambda i: (0, 0)),                # fc weight
            pl.BlockSpec((1, nc), lambda i: (0, 0)),                 # fc bias
        ],
        out_specs=pl.BlockSpec((tb, nc), lambda i: (i, 0)),
        out_shape=jax.ShapeDtypeStruct((Bp, nc), jnp.float32),
        compiler_params=pltpu.CompilerParams(
            dimension_semantics=("parallel",),
            vmem_limit_bytes=vmem_limit_bytes),
    )(x, w_pack, conv_b, fc_w.astype(jnp.float32),
      fc_b.reshape(1, -1).astype(jnp.float32))
    return out[:B]


# ---------------------------------------------------------------------------
# Pure-JAX reference (mirrors the PyTorch forward) for validation.
# ---------------------------------------------------------------------------
def text_cnn_reference(sentences, fixed_emb, train_emb, conv_ws, conv_bs, fc_w, fc_b):
    B, L = sentences.shape
    fixed = fixed_emb[sentences]
    embedded = train_emb[sentences]
    x = jnp.stack([fixed, embedded], axis=1)              # (B, 2, L, E)
    feats = []
    for w, b in zip(conv_ws, conv_bs):
        window_size = w.shape[1]
        Lout = L - window_size + 1
        out = jnp.zeros((B, Lout), jnp.float32)
        for c in range(2):
            for i in range(window_size):
                out = out + jnp.einsum("ble,e->bl", x[:, c, i:i + Lout, :], w[c, i])
        out = out + b[0]
        feats.append(jnp.max(jnp.tanh(out), axis=-1))
    features = jnp.stack(feats, axis=-1)
    logits = features @ fc_w + fc_b
    return jax.nn.log_softmax(logits, axis=-1)


if __name__ == "__main__":
    # Small, module-consistent shapes (module default E=300; shrunk for the test).
    word_size = 50
    embedding_size = 32
    B, L = 2, 16
    window_size_list = (2, 3, 4)
    num_classes = 6
    pad_token = 0

    key = jax.random.PRNGKey(0)
    k_fixed, k_emb, k_sent, k_fc_w, k_fc_b, k_conv = jax.random.split(key, 6)

    fixed_emb = jax.random.normal(k_fixed, (word_size, embedding_size), jnp.float32)
    fixed_emb = fixed_emb.at[pad_token].set(0.0)          # fixed_embedding[pad] = 0
    train_emb = jax.random.normal(k_emb, (word_size, embedding_size), jnp.float32)
    train_emb = train_emb.at[pad_token].set(0.0)          # nn.Embedding padding_idx

    conv_ws, conv_bs = [], []
    for j, wsz in enumerate(window_size_list):
        kw, kb = jax.random.split(jax.random.fold_in(k_conv, j))
        conv_ws.append(0.1 * jax.random.normal(kw, (2, wsz, embedding_size), jnp.float32))
        conv_bs.append(0.1 * jax.random.normal(kb, (1,), jnp.float32))

    # fc_w stored as (n_windows, num_classes) == PyTorch Linear weight transposed.
    fc_w = 0.1 * jax.random.normal(k_fc_w, (len(window_size_list), num_classes), jnp.float32)
    fc_b = 0.1 * jax.random.normal(k_fc_b, (num_classes,), jnp.float32)

    sentences = jax.random.randint(k_sent, (B, L), 0, word_size, dtype=jnp.int32)
    sentences = sentences.at[:, -2:].set(pad_token)       # include some <PAD>

    ref = text_cnn_reference(sentences, fixed_emb, train_emb, conv_ws, conv_bs, fc_w, fc_b)

    # f32 path: tight tolerance.
    out = text_cnn_forward(sentences, fixed_emb, train_emb, conv_ws, conv_bs,
                           fc_w, fc_b, compute_dtype=jnp.float32)
    out = jax.block_until_ready(out)
    np.testing.assert_allclose(np.asarray(out), np.asarray(ref), rtol=2e-4, atol=2e-5)

    # bf16 HBM/MXU path (f32 accumulation): loose tolerance.
    out_bf16 = text_cnn_forward(sentences, fixed_emb, train_emb, conv_ws, conv_bs,
                                fc_w, fc_b, compute_dtype=jnp.bfloat16)
    out_bf16 = jax.block_until_ready(out_bf16)
    np.testing.assert_allclose(np.asarray(out_bf16), np.asarray(ref), rtol=5e-2, atol=5e-2)

    print("KERNEL_OK")
</pallas_src>

<mosaic_0001>
module attributes {stable_mosaic.version = 11 : i64} {
  func.func @_textcnn_fused_kernel(%arg0: i32, %arg1: memref<2x16x64xf32, #tpu.memory_space<vmem>>, %arg2: memref<64x9xf32, #tpu.memory_space<vmem>>, %arg3: memref<3xf32, #tpu.memory_space<smem>>, %arg4: memref<3x6xf32, #tpu.memory_space<vmem>>, %arg5: memref<1x6xf32, #tpu.memory_space<vmem>>, %arg6: memref<2x6xf32, #tpu.memory_space<vmem>>) attributes {dimension_semantics = [#tpu.dimension_semantics<parallel>], iteration_bounds = array<i64: 1>, scalar_prefetch = 0 : i64, scratch_operands = 0 : i64, tpu.core_type = #tpu.core_type<tc>, window_params = [{transform_indices = @transform_0, window_bounds = array<i64: 2, 16, 64>}, {pipeline_mode = #tpu.pipeline_mode<synchronous>, transform_indices = @transform_1, window_bounds = array<i64: 64, 9>}, {transform_indices = @transform_2, window_bounds = array<i64: 3>}, {pipeline_mode = #tpu.pipeline_mode<synchronous>, transform_indices = @transform_3, window_bounds = array<i64: 3, 6>}, {pipeline_mode = #tpu.pipeline_mode<synchronous>, transform_indices = @transform_4, window_bounds = array<i64: 1, 6>}, {transform_indices = @transform_5, window_bounds = array<i64: 2, 6>}]} {
    %c0 = arith.constant 0 : index
    %c0_0 = arith.constant 0 : index
    %c0_1 = arith.constant 0 : index
    %0 = vector.load %arg1[%c0, %c0_0, %c0_1] : memref<2x16x64xf32, #tpu.memory_space<vmem>>, vector<2x16x64xf32>
    %1 = vector.shape_cast %0 : vector<2x16x64xf32> to vector<32x64xf32>
    %c0_2 = arith.constant 0 : index
    %c0_3 = arith.constant 0 : index
    %2 = vector.load %arg2[%c0_2, %c0_3] : memref<64x9xf32, #tpu.memory_space<vmem>>, vector<64x9xf32>
    %cst = arith.constant dense<0.000000e+00> : vector<32x9xf32>
    %3 = tpu.matmul %1, %2, %cst {dimension_numbers = #tpu.dot_dimension_numbers<[1], [0], [0], [1], [0, 0, 1, 1], [], []>} : vector<32x64xf32>, vector<64x9xf32>, vector<32x9xf32> -> vector<32x9xf32>
    %4 = vector.shape_cast %3 : vector<32x9xf32> to vector<2x16x9xf32>
    %c0_4 = arith.constant 0 : index
    %c0_5 = arith.constant 0 : index
    %5 = vector.load %arg4[%c0_4, %c0_5] : memref<3x6xf32, #tpu.memory_space<vmem>>, vector<3x6xf32>
    %c0_6 = arith.constant 0 : index
    %c0_7 = arith.constant 0 : index
    %6 = vector.load %arg5[%c0_6, %c0_7] : memref<1x6xf32, #tpu.memory_space<vmem>>, vector<1x6xf32>
    %7 = vector.shape_cast %6 : vector<1x6xf32> to vector<1x6xf32>
    %8 = vector.broadcast %7 : vector<1x6xf32> to vector<2x6xf32>
    %9 = vector.extract_strided_slice %4 {offsets = [0, 0, 0], sizes = [2, 15, 1], strides = [1, 1, 1]} : vector<2x16x9xf32> to vector<2x15x1xf32>
    %10 = vector.shape_cast %9 : vector<2x15x1xf32> to vector<2x15xf32>
    %11 = vector.extract_strided_slice %4 {offsets = [0, 1, 1], sizes = [2, 15, 1], strides = [1, 1, 1]} : vector<2x16x9xf32> to vector<2x15x1xf32>
    %12 = vector.shape_cast %11 : vector<2x15x1xf32> to vector<2x15xf32>
    %13 = arith.addf %10, %12 : vector<2x15xf32>
    %c0_8 = arith.constant 0 : index
    %14 = memref.load %arg3[%c0_8] : memref<3xf32, #tpu.memory_space<smem>>
    %15 = vector.broadcast %14 : f32 to vector<2x15xf32>
    %16 = arith.addf %13, %15 : vector<2x15xf32>
    %17 = math.tanh %16 : vector<2x15xf32>
    %cst_9 = arith.constant dense<0xFF800000> : vector<2xf32>
    %18 = vector.multi_reduction <maximumf>, %17, %cst_9 [1] : vector<2x15xf32> to vector<2xf32>
    %19 = vector.shape_cast %18 : vector<2xf32> to vector<2x1xf32>
    %20 = vector.extract_strided_slice %5 {offsets = [0, 0], sizes = [1, 6], strides = [1, 1]} : vector<3x6xf32> to vector<1x6xf32>
    %21 = vector.broadcast %19 : vector<2x1xf32> to vector<2x6xf32>
    %22 = vector.broadcast %20 : vector<1x6xf32> to vector<2x6xf32>
    %23 = arith.mulf %21, %22 : vector<2x6xf32>
    %24 = arith.addf %8, %23 : vector<2x6xf32>
    %25 = vector.extract_strided_slice %4 {offsets = [0, 0, 2], sizes = [2, 14, 1], strides = [1, 1, 1]} : vector<2x16x9xf32> to vector<2x14x1xf32>
    %26 = vector.shape_cast %25 : vector<2x14x1xf32> to vector<2x14xf32>
    %27 = vector.extract_strided_slice %4 {offsets = [0, 1, 3], sizes = [2, 14, 1], strides = [1, 1, 1]} : vector<2x16x9xf32> to vector<2x14x1xf32>
    %28 = vector.shape_cast %27 : vector<2x14x1xf32> to vector<2x14xf32>
    %29 = arith.addf %26, %28 : vector<2x14xf32>
    %30 = vector.extract_strided_slice %4 {offsets = [0, 2, 4], sizes = [2, 14, 1], strides = [1, 1, 1]} : vector<2x16x9xf32> to vector<2x14x1xf32>
    %31 = vector.shape_cast %30 : vector<2x14x1xf32> to vector<2x14xf32>
    %32 = arith.addf %29, %31 : vector<2x14xf32>
    %c1 = arith.constant 1 : index
    %33 = memref.load %arg3[%c1] : memref<3xf32, #tpu.memory_space<smem>>
    %34 = vector.broadcast %33 : f32 to vector<2x14xf32>
    %35 = arith.addf %32, %34 : vector<2x14xf32>
    %36 = math.tanh %35 : vector<2x14xf32>
    %cst_10 = arith.constant dense<0xFF800000> : vector<2xf32>
    %37 = vector.multi_reduction <maximumf>, %36, %cst_10 [1] : vector<2x14xf32> to vector<2xf32>
    %38 = vector.shape_cast %37 : vector<2xf32> to vector<2x1xf32>
    %39 = vector.extract_strided_slice %5 {offsets = [1, 0], sizes = [1, 6], strides = [1, 1]} : vector<3x6xf32> to vector<1x6xf32>
    %40 = vector.broadcast %38 : vector<2x1xf32> to vector<2x6xf32>
    %41 = vector.broadcast %39 : vector<1x6xf32> to vector<2x6xf32>
    %42 = arith.mulf %40, %41 : vector<2x6xf32>
    %43 = arith.addf %24, %42 : vector<2x6xf32>
    %44 = vector.extract_strided_slice %4 {offsets = [0, 0, 5], sizes = [2, 13, 1], strides = [1, 1, 1]} : vector<2x16x9xf32> to vector<2x13x1xf32>
    %45 = vector.shape_cast %44 : vector<2x13x1xf32> to vector<2x13xf32>
    %46 = vector.extract_strided_slice %4 {offsets = [0, 1, 6], sizes = [2, 13, 1], strides = [1, 1, 1]} : vector<2x16x9xf32> to vector<2x13x1xf32>
    %47 = vector.shape_cast %46 : vector<2x13x1xf32> to vector<2x13xf32>
    %48 = arith.addf %45, %47 : vector<2x13xf32>
    %49 = vector.extract_strided_slice %4 {offsets = [0, 2, 7], sizes = [2, 13, 1], strides = [1, 1, 1]} : vector<2x16x9xf32> to vector<2x13x1xf32>
    %50 = vector.shape_cast %49 : vector<2x13x1xf32> to vector<2x13xf32>
    %51 = arith.addf %48, %50 : vector<2x13xf32>
    %52 = vector.extract_strided_slice %4 {offsets = [0, 3, 8], sizes = [2, 13, 1], strides = [1, 1, 1]} : vector<2x16x9xf32> to vector<2x13x1xf32>
    %53 = vector.shape_cast %52 : vector<2x13x1xf32> to vector<2x13xf32>
    %54 = arith.addf %51, %53 : vector<2x13xf32>
    %c2 = arith.constant 2 : index
    %55 = memref.load %arg3[%c2] : memref<3xf32, #tpu.memory_space<smem>>
    %56 = vector.broadcast %55 : f32 to vector<2x13xf32>
    %57 = arith.addf %54, %56 : vector<2x13xf32>
    %58 = math.tanh %57 : vector<2x13xf32>
    %cst_11 = arith.constant dense<0xFF800000> : vector<2xf32>
    %59 = vector.multi_reduction <maximumf>, %58, %cst_11 [1] : vector<2x13xf32> to vector<2xf32>
    %60 = vector.shape_cast %59 : vector<2xf32> to vector<2x1xf32>
    %61 = vector.extract_strided_slice %5 {offsets = [2, 0], sizes = [1, 6], strides = [1, 1]} : vector<3x6xf32> to vector<1x6xf32>
    %62 = vector.broadcast %60 : vector<2x1xf32> to vector<2x6xf32>
    %63 = vector.broadcast %61 : vector<1x6xf32> to vector<2x6xf32>
    %64 = arith.mulf %62, %63 : vector<2x6xf32>
    %65 = arith.addf %43, %64 : vector<2x6xf32>
    %cst_12 = arith.constant dense<0xFF800000> : vector<2xf32>
    %66 = vector.multi_reduction <maximumf>, %65, %cst_12 [1] : vector<2x6xf32> to vector<2xf32>
    %67 = vector.shape_cast %66 : vector<2xf32> to vector<2x1xf32>
    %68 = vector.broadcast %67 : vector<2x1xf32> to vector<2x6xf32>
    %69 = arith.subf %65, %68 : vector<2x6xf32>
    %70 = math.exp %69 : vector<2x6xf32>
    %cst_13 = arith.constant dense<0.000000e+00> : vector<2xf32>
    %71 = vector.multi_reduction <add>, %70, %cst_13 [1] : vector<2x6xf32> to vector<2xf32>
    %72 = vector.shape_cast %71 : vector<2xf32> to vector<2x1xf32>
    %73 = math.log %72 : vector<2x1xf32>
    %74 = vector.broadcast %73 : vector<2x1xf32> to vector<2x6xf32>
    %75 = arith.subf %69, %74 : vector<2x6xf32>
    %c0_14 = arith.constant 0 : index
    %c0_15 = arith.constant 0 : index
    %76 = vector.load %arg6[%c0_14, %c0_15] : memref<2x6xf32, #tpu.memory_space<vmem>>, vector<2x6xf32>
    tpu.vector_store %arg6[%c0_14, %c0_15], %75 {strides = array<i32>} : memref<2x6xf32, #tpu.memory_space<vmem>>, vector<2x6xf32>,
    return
  }
  func.func @transform_0(%arg0: i32) -> (i32, i32, i32) {
    %c0_i32 = arith.constant 0 : i32
    %c0_i32_0 = arith.constant 0 : i32
    %c0_i32_1 = arith.constant 0 : i32
    return %arg0, %c0_i32, %c0_i32_0 : i32, i32, i32
  }
  func.func @transform_1(%arg0: i32) -> (i32, i32) {
    %c0_i32 = arith.constant 0 : i32
    %c0_i32_0 = arith.constant 0 : i32
    %c0_i32_1 = arith.constant 0 : i32
    return %c0_i32, %c0_i32_0 : i32, i32
  }
  func.func @transform_2(%arg0: i32) -> i32 {
    %c0_i32 = arith.constant 0 : i32
    %c0_i32_0 = arith.constant 0 : i32
    return %c0_i32 : i32
  }
  func.func @transform_3(%arg0: i32) -> (i32, i32) {
    %c0_i32 = arith.constant 0 : i32
    %c0_i32_0 = arith.constant 0 : i32
    %c0_i32_1 = arith.constant 0 : i32
    return %c0_i32, %c0_i32_0 : i32, i32
  }
  func.func @transform_4(%arg0: i32) -> (i32, i32) {
    %c0_i32 = arith.constant 0 : i32
    %c0_i32_0 = arith.constant 0 : i32
    %c0_i32_1 = arith.constant 0 : i32
    return %c0_i32, %c0_i32_0 : i32, i32
  }
  func.func @transform_5(%arg0: i32) -> (i32, i32) {
    %c0_i32 = arith.constant 0 : i32
    %c0_i32_0 = arith.constant 0 : i32
    return %arg0, %c0_i32 : i32, i32
  }
}

</mosaic_0001>

<bundles_post_ra>
// kernel: tpu_custom_call.1
= control target key start
LH: loop header
LB: loop body
LE: loop exit
PB: predicated region body
PF: predicated region fallthrough
CT: control target
= control target key end

     0   :  { %10 = vsyncpa [#allocation4], 0  ;;  %s695_s0 = inlined_call_operand.vmem [shape: f32[2,16,64], index: 0, kind: input, shape index: {}]   ;;  %s696_s1 = inlined_call_operand.vmem [shape: f32[64,9], index: 1, kind: input, shape index: {}]   ;;  %s697_s2 = inlined_call_operand.vmem [shape: f32[3], index: 2, kind: input, shape index: {}]   ;;  %s698_s3 = inlined_call_operand.vmem [shape: f32[3,6], index: 3, kind: input, shape index: {}]   ;;  %s699_s4 = inlined_call_operand.vmem [shape: f32[1,6], index: 4, kind: input, shape index: {}]   ;;  %s700_s5 = inlined_call_operand.hbm [shape: f32[2,6], index: 5, kind: output, shape index: {}]  }
   0x1   :  { %11 = vsyncpa [#allocation3], 0  ;;  %s22_s20 = sshll.u32 %s697_s2, 4  ;;  %s23_s20 = int_to_ptr.vmem [resolvable:$true] %s22_s20 }
   0x2   :  { %s534_s21 = scalar_lea.vmem %s23_s20, 16  ;;  %p539_p1 = scmp.lt.s32.totalorder %s23_s20, %s23_s20 }
   0x3   :  { %p535_p0 = scmp.ne.s32.totalorder %s23_s20, %s534_s21  ;;  %p540_p2 = scmp.lt.s32.totalorder %s534_s21, %s534_s21 }
   0x5   :  { %p541_p3 = por %p540_p2, %p539_p1 }
   0x7   :  { %p542_p4 = pnand %p541_p3, %p535_p0 }
   0x9   :  { %545 = shalt.err (!%p542_p4)
}
   0xa   :  { %s572_s22 = smov [#allocation2]  }
   0xb   :  { %25 = dma.vmem_to_smem %s23_s20, 16, %s572_s22, [#allocation4]  }
   0xc   :  { %568 = dma.done.wait [#allocation4], 16  }
   0xd   :  { %569 = vsyncadd [#allocation4], 4294967280 }
   0xe   :  { %33 = sfence }
   0xf   :  { %v38_v0 = vld [vmem:[%s696_s1] sm:$0xff]  ;;  %v39_v1 = vld [vmem:[%s696_s1 + $0x8] sm:$0xff]  ;;  %v40_v2 = vld [vmem:[%s696_s1 + $0x10] sm:$0xff]  ;;  %vm46_vm0 = vcmask 523264   ;;  %vm156_vm1 = vcmask 1046528   ;;  %vm240_vm2 = vcmask 1045504  }
  0x10   :  { %v468_v3 = vpack.c.bf16 %v39_v1, %v38_v0  ;;  %v41_v4 = vld [vmem:[%s696_s1 + $0x18] sm:$0xff]  ;;  %v42_v6 = vld [vmem:[%s696_s1 + $0x20] sm:$0xff]  ;;  %v43_v7 = vld [vmem:[%s696_s1 + $0x28] sm:$0xff]  ;;  %vm319_vm3 = vcmask 1044480   ;;  %s574_s20 = smov 126   ;;  %v575_v38 = vmov 0  }
  0x11   :  { %v472_v5 = vpack.c.bf16 %v41_v4, %v40_v2  ;;  %v34_v8 = vld [vmem:[%s695_s0] sm:$0xff]  ;;  %v36_v9 = vld [vmem:[%s695_s0 + $0x10] sm:$0xff]  ;;  %v476_v10 = vpack.c.bf16 %v43_v7, %v42_v6  ;;  %v45_v12 = vld [vmem:[%s696_s1 + $0x38] sm:$0xff]  ;;  %501 = vset.pattern.permute.xlu0 %v575_v38  ;;  %500 = vset.pattern.permute.xlu1 %v575_v38  ;;  %s576_s21 = smov 125   ;;  %s179_s22 = sld [smem:[#allocation2]]  ;;  %vm216_vm4 = vcmask 130112  }
  0x12   :  { %469 = vmatprep.subr.bf16.mxu0 %v468_v3  ;;  %484 = vmatprep.subr.bf16.mxu1 %v468_v3  ;;  %v44_v11 = vld [vmem:[%s696_s1 + $0x30] sm:$0xff]  ;;  %v35_v14 = vld [vmem:[%s695_s0 + $0x8] sm:$0xff]  ;;  %v37_v15 = vld [vmem:[%s695_s0 + $0x18] sm:$0xff]  ;;  %s573_s0 = smov 127   ;;  %s432_s23 = sld [smem:[#allocation2 + $0x1]]  ;;  %vm227_vm5 = vcmask 1041409  }
  0x13   :  { %471 = vmatpush3.bf16.msra.mxu0 %v468_v3  ;;  %488 = vmatpush3.bf16.msra.mxu1 %v468_v3  ;;  %v480_v13 = vpack.c.bf16 %v45_v12, %v44_v11  ;;  %s433_s24 = sld [smem:[#allocation2 + $0x2]]  ;;  %vm230_vm6 = vcmask 115712   ;;  %vm309_vm7 = vcmask 107520   ;;  %vm388_vm8 = vcmask 99328  }
  0x14   :  { %473 = vmatprep.subr.bf16.mxu0 %v472_v5  ;;  %485 = vmatprep.subr.bf16.mxu1 %v472_v5  ;;  %vm398_vm9 = vcmask 41984  }
  0x15   :  { %462 = vmatprep.mubr.msk.f32.mxu0 %vm46_vm0, %v34_v8  ;;  %465 = vmatprep.mubr.msk.f32.mxu1 %vm46_vm0, %v36_v9 }
  0x17   :  { %475 = vmatpush3.bf16.msra.mxu0 %v472_v5  ;;  %489 = vmatpush3.bf16.msra.mxu1 %v472_v5  ;;  %v180_v39 = vstv %s179_s22 }
  0x18   :  { %477 = vmatprep.subr.bf16.mxu0 %v476_v10  ;;  %486 = vmatprep.subr.bf16.mxu1 %v476_v10  ;;  %v264_v51 = vstv %s432_s23 }
  0x19   :  { %v343_v1 = vstv %s433_s24 }
  0x1b   :  { %479 = vmatpush3.bf16.msra.mxu0 %v476_v10  ;;  %490 = vmatpush3.bf16.msra.mxu1 %v476_v10  ;;  %v577_v10 = vmov 2  }
  0x1c   :  { %481 = vmatprep.subr.bf16.mxu0 %v480_v13  ;;  %487 = vmatprep.subr.bf16.mxu1 %v480_v13 }
  0x1f   :  { %483 = vmatpush3.bf16.msra.mxu0 %v480_v13  ;;  %491 = vmatpush3.bf16.msra.mxu1 %v480_v13 }
  0x22   :  { %463 = vmatmul.mubr.msk.f32.vlgmr.msra.gmra.mrb[0].mxu0 %vm46_vm0, %v35_v14  ;;  %466 = vmatmul.mubr.msk.f32.vlgmr.msra.gmra.mrb[0].mxu1 %vm46_vm0, %v37_v15  ;;  %v578_v14 = vmov 5  }
  0xf5   :  { %v464_v16 = vpop.f32.mrb[0].mxu0  ;;  %v467_v17 = vpop.f32.mrb[0].mxu1 }
  0xf6   :  { %v653_v18 = vpop.f32.mrb[1].mxu1  ;;  %v161_v19 = vrot.slane %v467_v17, 1  ;;  %v158_v20 = vrot.slane %v464_v16, 1  ;;  %v125_v21 = vpop.f32.mrb[1].mxu0  ;;  %v242_v22 = vrot.slane %v464_v16, 2  ;;  %v245_v23 = vrot.slane %v467_v17, 2 }
  0xf7   :  { %v160_v24 = vrot.slane %v653_v18, 1  ;;  %v244_v25 = vrot.slane %v653_v18, 2  ;;  %v323_v26 = vrot.slane %v653_v18, 3  ;;  %v157_v27 = vrot.slane %v125_v21, 1 }
  0xf8   :  { %169 = vrot.lane.b32.xlu1 %v161_v19, %s573_s0  ;;  %165 = vrot.lane.b32.xlu0 %v158_v20, %s573_s0  ;;  %v241_v28 = vrot.slane %v125_v21, 2  ;;  %v320_v29 = vrot.slane %v125_v21, 3  ;;  %v321_v30 = vrot.slane %v464_v16, 3  ;;  %v324_v31 = vrot.slane %v467_v17, 3 }
  0xf9   :  { %v159_v32 = vsel %vm156_vm1, %v157_v27, %v158_v20  ;;  %v246_v33 = vsel %vm240_vm2, %v244_v25, %v245_v23  ;;  %v162_v34 = vsel %vm156_vm1, %v160_v24, %v161_v19 }
  0xfa   :  { %v243_v35 = vsel %vm240_vm2, %v241_v28, %v242_v22  ;;  %v322_v36 = vsel %vm319_vm3, %v320_v29, %v321_v30  ;;  %v325_v37 = vsel %vm319_vm3, %v323_v26, %v324_v31  ;;  %v205_v28 = vlaneseq }
  0xfc   :  { %249 = vrot.lane.b32.xlu1 %v242_v22, %s574_s20  ;;  %163 = vrot.lane.b32.xlu0 %v159_v32, %s573_s0  ;;  %v206_v29 = vand.u32 127, %v205_v28 }
  0xfe   :  { %v211_v32 = vadd.s32 4294967288, %v206_v29 }
 0x100   :  { %253 = vrot.lane.b32.xlu1 %v245_v23, %s574_s20  ;;  %247 = vrot.lane.b32.xlu0 %v243_v35, %s574_s20 }
 0x104   :  { %328 = vrot.lane.b32.xlu1 %v321_v30, %s576_s21  ;;  %251 = vrot.lane.b32.xlu0 %v246_v33, %s574_s20 }
 0x108   :  { %167 = vrot.lane.b32.xlu1 %v162_v34, %s573_s0  ;;  %326 = vrot.lane.b32.xlu0 %v322_v36, %s576_s21 }
 0x10c   :  { %332 = vrot.lane.b32.xlu1 %v324_v31, %s576_s21  ;;  %330 = vrot.lane.b32.xlu0 %v325_v37, %s576_s21  ;;  %v208_v31 = vshrl.u32 %v205_v28, 7 }
 0x10e   :  { %v209_v33 = vsub.s32 %v206_v29, %v208_v31  ;;  %v214_v36 = vsub.s32 %v211_v32, %v208_v31 }
 0x16a   :  { %v170_v40 = vpop.permute.xlu1 %169  ;;  %v166_v41 = vpop.permute.xlu0 %165 }
 0x16b   :  { %v178_v42 = vadd.f32 %v467_v17, %v170_v40  ;;  %v176_v43 = vadd.f32 %v464_v16, %v166_v41 }
 0x16d   :  { %v184_v44 = vadd.f32 %v180_v39, %v178_v42  ;;  %v182_v45 = vadd.f32 %v180_v39, %v176_v43 }
 0x16e   :  { %v250_v46 = vpop.permute.xlu1 %249  ;;  %v164_v47 = vpop.permute.xlu0 %163 }
 0x16f   :  { %506 = vtanh.f32 %v184_v44  ;;  %v175_v48 = vadd.f32 %v164_v47, %v125_v21  ;;  %v260_v49 = vadd.f32 %v250_v46, %v176_v43 }
 0x170   :  { %508 = vtanh.f32 %v182_v45 }
 0x171   :  { %v181_v50 = vadd.f32 %v180_v39, %v175_v48  ;;  %v266_v54 = vadd.f32 %v264_v51, %v260_v49 }
 0x172   :  { %v254_v52 = vpop.permute.xlu1 %253  ;;  %v248_v53 = vpop.permute.xlu0 %247 }
 0x173   :  { %510 = vtanh.f32 %v181_v50  ;;  %v259_v58 = vadd.f32 %v248_v53, %v175_v48  ;;  %v262_v0 = vadd.f32 %v254_v52, %v178_v42 }
 0x174   :  { %512 = vtanh.f32 %v266_v54 }
 0x175   :  { %v268_v7 = vadd.f32 %v264_v51, %v262_v0  ;;  %v265_v11 = vadd.f32 %v264_v51, %v259_v58 }
 0x176   :  { %v329_v55 = vpop.permute.xlu1 %328  ;;  %v252_v56 = vpop.permute.xlu0 %251 }
 0x177   :  { %v339_v16 = vadd.f32 %v329_v55, %v260_v49 }
 0x179   :  { %v507_v57 = vpop.eup %506  ;;  %v345_v20 = vadd.f32 %v343_v1, %v339_v16 }
 0x17a   :  { %v509_v59 = vpop.eup %508  ;;  %v168_v60 = vpop.permute.xlu1 %167  ;;  %203 = vperm.xlu0 %501, %v507_v57  }
 0x17b   :  { %v327_v61 = vpop.permute.xlu0 %326  ;;  %v177_v62 = vadd.f32 %v168_v60, %v653_v18  ;;  %197 = vperm.xlu1 %500, %v509_v59  }
 0x17c   :  { %v338_v63 = vadd.f32 %v327_v61, %v259_v58 }
 0x17d   :  { %v183_v2 = vadd.f32 %v180_v39, %v177_v62  ;;  %v511_v4 = vpop.eup %510  ;;  %v261_v12 = vadd.f32 %v252_v56, %v177_v62 }
 0x17e   :  { %v344_v3 = vadd.f32 %v343_v1, %v338_v63  ;;  %v333_v5 = vpop.permute.xlu1 %332  ;;  %194 = vperm.xlu0 %501, %v511_v4   ;;  %v513_v9 = vpop.eup %512 }
 0x17f   :  { %514 = vtanh.f32 %v183_v2  ;;  %v341_v6 = vadd.f32 %v333_v5, %v262_v0  ;;  %v267_v13 = vadd.f32 %v264_v51, %v261_v12  ;;  %v331_v18 = vpop.permute.xlu0 %330 }
 0x180   :  { %516 = vtanh.f32 %v344_v3  ;;  %v340_v21 = vadd.f32 %v331_v18, %v261_v12  ;;  %v394_v12 = vsub.s32 2, %v208_v31 }
 0x181   :  { %v347_v8 = vadd.f32 %v343_v1, %v341_v6  ;;  %v236_v6 = vsub.s32 0, %v208_v31 }
 0x182   :  { %502 = vset.pattern.permute.xlu0 %v577_v10  ;;  %v346_v23 = vadd.f32 %v343_v1, %v340_v21 }
 0x183   :  { %518 = vtanh.f32 %v347_v8  ;;  %281 = vperm.xlu0 %502, %v513_v9   ;;  %v315_v8 = vsub.s32 1, %v208_v31 }
 0x184   :  { %520 = vtanh.f32 %v268_v7  ;;  %v144_v7 = vld [vmem:[%s698_s3] sm:$0x7]  ;;  %s579_s3 = smov [#allocation5]  }
 0x185   :  { %522 = vtanh.f32 %v265_v11  ;;  %v237_v9 = vrot.slane %v144_v7, %v236_v6  ;;  %v316_v11 = vrot.slane %v144_v7, %v315_v8 }
 0x186   :  { %524 = vtanh.f32 %v267_v13 }
 0x187   :  { %505 = vset.pattern.permute.xlu0 %v578_v14  ;;  %526 = vtanh.f32 %v345_v20 }
 0x188   :  { %528 = vtanh.f32 %v346_v23 }
 0x189   :  { %v515_v15 = vpop.eup %514 }
 0x18a   :  { %v517_v17 = vpop.eup %516  ;;  %200 = vperm.xlu1 %500, %v515_v15   ;;  %v431_v15 = vld [vmem:[%s699_s4] ss:$0 sm:$0xff]  ;;  %s418_s4 = sshll.u32 %s579_s3, 4  ;;  %s419_s4 = int_to_ptr.vmem [resolvable:$true] %s418_s4 }
 0x18b   :  { %357 = vperm.xlu0 %505, %v517_v17   ;;  %v395_v17 = vrot.slane %v144_v7, %v394_v12  ;;  %s546_s28 = scalar_lea.vmem %s419_s4, 32  ;;  %p551_p6 = scmp.lt.s32.totalorder %s419_s4, %s419_s4 }
 0x18c   :  { %p547_p5 = scmp.ne.s32.totalorder %s419_s4, %s546_s28  ;;  %p552_p7 = scmp.lt.s32.totalorder %s546_s28, %s546_s28 }
 0x18d   :  { %v519_v19 = vpop.eup %518 }
 0x18e   :  { %v521_v22 = vpop.eup %520  ;;  %503 = vset.pattern.permute.xlu1 %v577_v10  ;;  %p553_p8 = por %p552_p7, %p551_p6 }
 0x18f   :  { %366 = vperm.xlu0 %505, %v519_v19   ;;  %287 = vperm.xlu1 %503, %v521_v22   ;;  %v523_v24 = vpop.eup %522 }
 0x190   :  { %v525_v25 = vpop.eup %524  ;;  %p554_p9 = pnand %p553_p8, %p547_p5 }
 0x191   :  { %v527_v26 = vpop.eup %526 }
 0x192   :  { %v529_v27 = vpop.eup %528 }
 0x193   :  { %278 = vperm.xlu1 %503, %v523_v24  }
 0x197   :  { %284 = vperm.xlu1 %503, %v525_v25  }
 0x19b   :  { %504 = vset.pattern.permute.xlu1 %v578_v14 }
 0x19c   :  { %360 = vperm.xlu1 %504, %v527_v26  }
 0x1a0   :  { %363 = vperm.xlu1 %504, %v529_v27  }
 0x1f9   :  { %v204_v30 = vpop.permute.xlu0 %203 }
 0x1fa   :  { %v198_v34 = vpop.permute.xlu1 %197  ;;  %v225_v40 = vrot.slane %v204_v30, %v214_v36 }
 0x1fb   :  { %v215_v39 = vrot.slane %v198_v34, %v214_v36 }
 0x1fd   :  { %v195_v35 = vpop.permute.xlu0 %194 }
 0x1fe   :  { %v210_v37 = vrot.slane %v195_v35, %v209_v33 }
 0x200   :  { %v217_v42 = vsel %vm216_vm4, %v215_v39, %v210_v37 }
 0x202   :  { %v282_v48 = vpop.permute.xlu0 %281 }
 0x203   :  { %v296_v51 = vrot.slane %v282_v48, %v214_v36 }
 0x209   :  { %v201_v38 = vpop.permute.xlu1 %200 }
 0x20a   :  { %v221_v41 = vrot.slane %v201_v38, %v209_v33  ;;  %v358_v52 = vpop.permute.xlu0 %357 }
 0x20b   :  { %v371_v63 = vrot.slane %v358_v52, %v209_v33 }
 0x20c   :  { %v226_v43 = vsel %vm216_vm4, %v225_v40, %v221_v41 }
 0x20d   :  { %v228_v44 = vsel %vm227_vm5, %v226_v43, %v217_v42 }
 0x20e   :  { %v288_v45 = vpop.permute.xlu1 %287  ;;  %v231_v46 = vsel %vm230_vm6, %v228_v44, -inf  ;;  %v367_v60 = vpop.permute.xlu0 %366 }
 0x20f   :  { %232 = vmax.xlane.f32.xlu1 %v231_v46  ;;  %v305_v53 = vrot.slane %v288_v45, %v214_v36  ;;  %v384_v0 = vrot.slane %v367_v60, %v214_v36 }
 0x212   :  { %v279_v47 = vpop.permute.xlu1 %278 }
 0x213   :  { %v292_v49 = vrot.slane %v279_v47, %v209_v33 }
 0x215   :  { %v297_v55 = vsel %vm216_vm4, %v296_v51, %v292_v49 }
 0x216   :  { %v285_v50 = vpop.permute.xlu1 %284 }
 0x217   :  { %v301_v54 = vrot.slane %v285_v50, %v209_v33 }
 0x219   :  { %v306_v56 = vsel %vm216_vm4, %v305_v53, %v301_v54 }
 0x21a   :  { %v307_v57 = vsel %vm227_vm5, %v306_v56, %v297_v55 }
 0x21b   :  { %v361_v58 = vpop.permute.xlu1 %360  ;;  %v310_v59 = vsel %vm309_vm7, %v307_v57, -inf }
 0x21c   :  { %311 = vmax.xlane.f32.xlu0 %v310_v59  ;;  %v375_v61 = vrot.slane %v361_v58, %v214_v36 }
 0x21e   :  { %v376_v2 = vsel %vm216_vm4, %v375_v61, %v371_v63 }
 0x21f   :  { %v364_v62 = vpop.permute.xlu1 %363 }
 0x220   :  { %v380_v1 = vrot.slane %v364_v62, %v209_v33 }
 0x222   :  { %v385_v3 = vsel %vm216_vm4, %v384_v0, %v380_v1 }
 0x223   :  { %v386_v4 = vsel %vm227_vm5, %v385_v3, %v376_v2 }
 0x224   :  { %v389_v5 = vsel %vm388_vm8, %v386_v4, -inf }
 0x225   :  { %390 = vmax.xlane.f32.xlu0 %v389_v5 }
 0x29c   :  { %v233_v10 = vpop.xlane.xlu1 %232 }
 0x29d   :  { %v238_v14 = vmul.f32 %v237_v9, %v233_v10 }
 0x29f   :  { %v239_v18 = vadd.f32 %v431_v15, %v238_v14 }
 0x2a9   :  { %v312_v13 = vpop.xlane.xlu0 %311 }
 0x2aa   :  { %v317_v16 = vmul.f32 %v316_v11, %v312_v13 }
 0x2ac   :  { %v318_v20 = vadd.f32 %v317_v16, %v239_v18 }
 0x2b2   :  { %v391_v19 = vpop.xlane.xlu0 %390 }
 0x2b3   :  { %v396_v21 = vmul.f32 %v395_v17, %v391_v19 }
 0x2b5   :  { %v397_v22 = vadd.f32 %v396_v21, %v318_v20 }
 0x2b7   :  { %v399_v23 = vsel %vm398_vm9, %v397_v22, -inf }
 0x2b8   :  { %400 = vmax.xlane.f32.xlu1 %v399_v23 }
 0x345   :  { %v401_v24 = vpop.xlane.xlu1 %400 }
 0x346   :  { %v402_v25 = vsub.f32 %v397_v22, %v401_v24 }
 0x348   :  { %v403_v26 = vmul.f32 1.442695, %v402_v25 }
 0x34a   :  { %530 = vpow2.f32 %v403_v26 }
 0x354   :  { %v531_v27 = vpop.eup %530 }
 0x355   :  { %v405_v28 = vsel %vm398_vm9, %v531_v27, 0.0 }
 0x356   :  { %406 = vadd.xlane.f32.xlu0 %v405_v28 }
 0x3e3   :  { %v407_v29 = vpop.xlane.xlu0 %406 }
 0x3e4   :  { %532 = vlog2.f32 %v407_v29 }
 0x3ee   :  { %v533_v30 = vpop.eup %532 }
 0x3ef   :  { %v409_v31 = vmul.f32 0.6931472, %v533_v30 }
 0x3f1   :  { %v410_v32 = vsub.f32 %v402_v25, %v409_v31 }
 0x3f3   :  { %411 = vst.msk [vmem:[#allocation5] sm:$0x3] %vm398_vm9, %v410_v32 }
 0x3f4   :  { %557 = shalt.err (!%p554_p9)
}
 0x3f5   :  { %s558_s6 = scalar_lea.hbm %s700_s5, 32 }
 0x3f6   :  { %p559_p10 = scmp.ne.s32.totalorder %s700_s5, %s558_s6  ;;  %p562_p11 = scmp.lt.u32.totalorder %s558_s6, %s700_s5 }
 0x3f8   :  { %p564_p12 = pnand %p562_p11, %p559_p10 }
 0x3fa   :  { %567 = shalt.err (!%p564_p12)
}
 0x3fb   :  { %421 = dma.vmem_to_hbm [thread:$0]  %s419_s4, 32, %s700_s5, [#allocation3]  }
 0x3fc   :  { %570 = dma.done.wait [#allocation3], 32  }
 0x3fd   :  { %571 = vsyncadd [#allocation3], 4294967264 }
 0x3fe   :  { %425 = vsyncpa [#allocation3], 1 }
 0x3ff   :  { %426 = vsyncpa [#allocation4], 1 }

</bundles_post_ra>
